<compile_context>
chip_gen: v7x
topology: tpu7x:2x2x1
jax: 0.10.0
libtpu: 0.0.40
codegen_flags: <defaults>
</compile_context>

<pallas_src>
import functools

import jax
import jax.numpy as jnp
from jax.experimental import pallas as pl
from jax.experimental.pallas import tpu as pltpu


# ---------------------------------------------------------------------------
# Fused kernel: im2col-by-DMA + one fat MXU matmul.
# ---------------------------------------------------------------------------
def _choose_rows_a(thp, wp, max_rows=1024, max_a=64):
    """Largest divisor A of T*HP with A*WP <= max_rows (and bounded unroll)."""
    best = 1
    for a in range(1, thp + 1):
        if thp % a == 0 and a <= max_a and a * wp <= max_rows:
            best = a
    return best


def _fused_patch_embed(x, weight, bias, patch_size, out_dtype):
    B, C, T, H, W = x.shape
    P = patch_size
    E = weight.shape[0]
    assert H % P == 0 and W % P == 0, "H, W must be divisible by patch_size"
    HP, WP = H // P, W // P
    NP = HP * WP
    K = C * P * P
    THP = T * HP
    M = B * THP * WP                      # = B * T * num_patches

    A = _choose_rows_a(THP, WP)           # (t, hp) patch-rows per block
    R = A * WP                            # matmul rows per block
    n_tb = THP // A
    nsteps = B * n_tb

    # Metadata-only view: split H -> (HP, P) and W -> (WP, P), merge (T, HP).
    x6 = x.reshape(B, C, THP, P, WP, P)   # (b, c, t*hp, ph, wp, pw)
    # Tiny parameter reshapes; K order = (c, ph, pw), matching the DMA scatter.
    w_flat = jnp.transpose(weight.reshape(E, K)).astype(jnp.bfloat16)  # (K, E)
    b_flat = bias.reshape(1, E).astype(jnp.float32)

    def block_copies(x_ref, buf_ref, sem_ref, block_idx, slot):
        """The C*P strided DMAs that materialise one (R, K) patch block."""
        b = block_idx // n_tb
        thp0 = (block_idx % n_tb) * A
        copies = []
        for c in range(C):
            for ph in range(P):
                col0 = (c * P + ph) * P
                copies.append(
                    pltpu.make_async_copy(
                        # HBM: rows hp*P+ph of each patch-row, full image width.
                        x_ref.at[b, c, pl.ds(thp0, A), ph, :, :],      # (A, WP, P)
                        # VMEM: column slab (c, ph, 0:P) of the patch matrix.
                        buf_ref.at[slot, :, :, pl.ds(col0, P)],        # (A, WP, P)
                        sem_ref.at[slot],
                    ))
        return copies

    def kernel(x_ref, w_ref, b_ref, o_ref, buf_ref, patch_ref, sem_ref):
        step = pl.program_id(0)
        num = pl.num_programs(0)
        slot = step % 2

        # Prime the pipeline with block 0 on the very first step.
        @pl.when(step == 0)
        def _prime():
            for cp in block_copies(x_ref, buf_ref, sem_ref, step, slot):
                cp.start()

        # Prefetch block step+1 into the other slot (overlaps this step's dot).
        @pl.when(step + 1 < num)
        def _prefetch_next():
            nxt = step + 1
            for cp in block_copies(x_ref, buf_ref, sem_ref, nxt, nxt % 2):
                cp.start()

        # Wait for the current block's DMAs.
        for cp in block_copies(x_ref, buf_ref, sem_ref, step, slot):
            cp.wait()

        # Collapse (A, WP, K) f32 -> (R, K) bf16 with full-lane-width copies.
        for a in range(A):
            patch_ref[pl.ds(a * WP, WP), :] = buf_ref[slot, a].astype(jnp.bfloat16)

        acc = jnp.dot(patch_ref[...], w_ref[...], preferred_element_type=jnp.float32)
        o_ref[...] = (acc + b_ref[...]).astype(o_ref.dtype)

    cost = pl.CostEstimate(
        flops=2 * M * K * E,
        transcendentals=0,
        bytes_accessed=(M * K * x.dtype.itemsize          # x read exactly once
                        + K * E * 2                       # bf16 weight
                        + M * E * jnp.dtype(out_dtype).itemsize
                        + E * 4),
    )

    out = pl.pallas_call(
        kernel,
        out_shape=jax.ShapeDtypeStruct((M, E), out_dtype),
        grid_spec=pltpu.PrefetchScalarGridSpec(
            num_scalar_prefetch=0,
            grid=(nsteps,),
            in_specs=[
                pl.BlockSpec(memory_space=pl.ANY),        # x: raw HBM, manual DMA
                pl.BlockSpec((K, E), lambda i: (0, 0)),   # weight (VMEM-resident)
                pl.BlockSpec((1, E), lambda i: (0, 0)),   # bias   (VMEM-resident)
            ],
            out_specs=pl.BlockSpec((R, E), lambda i: (i, 0)),
            scratch_shapes=[
                pltpu.VMEM((2, A, WP, K), jnp.float32),   # double-buffered patch block
                pltpu.VMEM((R, K), jnp.bfloat16),         # bf16 LHS for the MXU
                pltpu.SemaphoreType.DMA((2,)),            # one DMA sem per slot
            ],
        ),
        compiler_params=pltpu.CompilerParams(
            dimension_semantics=("arbitrary",),   # manual cross-step prefetch
            vmem_limit_bytes=32 * 1024 * 1024,
        ),
        cost_estimate=cost,
    )(x6, w_flat, b_flat)

    # (M, E) -> (B*T, num_patches, E): contiguous metadata reshape only.
    return out.reshape(B * T, NP, E)


# ---------------------------------------------------------------------------
# Fallback: previously-reviewed staged-im2col kernel (wrapper-side rearrange).
# Only used if the manual-DMA pattern above fails to lower on this build.
# ---------------------------------------------------------------------------
def _staged_proj_kernel(p_ref, w_ref, b_ref, o_ref):
    acc = jnp.dot(p_ref[...], w_ref[...], preferred_element_type=jnp.float32)
    o_ref[...] = (acc + b_ref[...]).astype(o_ref.dtype)


def _staged_patch_embed(x, weight, bias, patch_size, out_dtype):
    B, C, T, H, W = x.shape
    P = patch_size
    E = weight.shape[0]
    HP, WP = H // P, W // P
    NP = HP * WP
    K = C * P * P
    M = B * T * NP

    patches = x.reshape(B, C, T, HP, P, WP, P)
    patches = jnp.transpose(patches, (0, 2, 3, 5, 1, 4, 6)).reshape(M, K)
    patches = patches.astype(jnp.bfloat16)
    w_flat = jnp.transpose(weight.reshape(E, K)).astype(jnp.bfloat16)
    b_flat = bias.reshape(1, E).astype(jnp.float32)

    tm = 512 if M >= 512 else M           # large row tile; last block masked
    out = pl.pallas_call(
        _staged_proj_kernel,
        out_shape=jax.ShapeDtypeStruct((M, E), out_dtype),
        grid_spec=pltpu.PrefetchScalarGridSpec(
            num_scalar_prefetch=0,
            grid=(pl.cdiv(M, tm),),
            in_specs=[
                pl.BlockSpec((tm, K), lambda i: (i, 0)),
                pl.BlockSpec((K, E), lambda i: (0, 0)),
                pl.BlockSpec((1, E), lambda i: (0, 0)),
            ],
            out_specs=pl.BlockSpec((tm, E), lambda i: (i, 0)),
        ),
        compiler_params=pltpu.CompilerParams(
            dimension_semantics=("parallel",),
            vmem_limit_bytes=32 * 1024 * 1024,
        ),
    )(patches, w_flat, b_flat)
    return out.reshape(B * T, NP, E)


# ---------------------------------------------------------------------------
# Public wrapper (module-equivalent forward).
# ---------------------------------------------------------------------------
@functools.partial(jax.jit, static_argnums=(3, 4, 5))
def _patch_embed_impl(x, weight, bias, patch_size, out_dtype, fused):
    if fused:
        return _fused_patch_embed(x, weight, bias, patch_size, out_dtype)
    return _staged_patch_embed(x, weight, bias, patch_size, out_dtype)


def patch_embed_forward(x, weight, bias, patch_size, out_dtype=None):
    """Pallas implementation of PatchEmbed.forward.

    Args:
      x: (B, C, T, H, W) float32 input video.
      weight: (E, C, P, P) conv weight (kernel_size == stride == P).
      bias: (E,) conv bias.
      patch_size: int P.
      out_dtype: output dtype (default: x.dtype; pass jnp.bfloat16 to halve the
        output HBM stream when the downstream transformer consumes bf16).
    Returns:
      (out, T, W_out) with out of shape (B*T, num_patches, E).
    """
    T = x.shape[2]
    w_out = x.shape[4] // patch_size
    out_dtype = jnp.dtype(x.dtype if out_dtype is None else out_dtype)
    try:
        out = _patch_embed_impl(x, weight, bias, patch_size, out_dtype, True)
        out = jax.block_until_ready(out)
    except Exception:
        # Capability fallback only (numerics are still asserted by the caller).
        # TODO(synk): drop once the manual-DMA im2col path is confirmed on all
        # deployed jax/Mosaic versions.
        out = _patch_embed_impl(x, weight, bias, patch_size, out_dtype, False)
        out = jax.block_until_ready(out)
    return out, T, w_out


# ---------------------------------------------------------------------------
# Pure-JAX reference (conv), bf16 operands + f32 accumulate to match numerics.
# ---------------------------------------------------------------------------
def _reference(x, weight, bias, patch_size):
    B, C, T, H, W = x.shape
    P = patch_size
    E = weight.shape[0]
    x_bt = jnp.transpose(x, (0, 2, 1, 3, 4)).reshape(B * T, C, H, W)
    y = jax.lax.conv_general_dilated(
        x_bt.astype(jnp.bfloat16), weight.astype(jnp.bfloat16),
        window_strides=(P, P), padding="VALID",
        dimension_numbers=("NCHW", "OIHW", "NCHW"),
        preferred_element_type=jnp.float32)
    y = y + bias.reshape(1, E, 1, 1).astype(jnp.float32)
    y = y.reshape(B * T, E, -1).transpose(0, 2, 1)   # flatten(2).transpose(1, 2)
    return y, T, W // P


if __name__ == "__main__":
    # Small shapes consistent with the module: B=2, C=4, T=2, H=W=16, P=8, E=32.
    B, C, T, H, W = 2, 4, 2, 16, 16
    P, E = 8, 32

    key = jax.random.PRNGKey(0)
    kx, kw, kb = jax.random.split(key, 3)
    x = jax.random.normal(kx, (B, C, T, H, W), dtype=jnp.float32)
    # Deterministic synthetic parameters (not a checkpoint load).
    fan_in = C * P * P
    weight = jax.random.normal(kw, (E, C, P, P), dtype=jnp.float32) / jnp.sqrt(fan_in)
    bias = jax.random.normal(kb, (E,), dtype=jnp.float32) * 0.02

    out, t_out, w_out = patch_embed_forward(x, weight, bias, P)
    out = jax.block_until_ready(out)

    ref, t_ref, wout_ref = _reference(x, weight, bias, P)
    assert out.shape == (B * T, (H // P) * (W // P), E)
    assert t_out == t_ref and w_out == wout_ref
    assert jnp.allclose(out, ref, atol=2e-3, rtol=2e-3)

    print("KERNEL_OK")
</pallas_src>

<mosaic_0001>
module attributes {stable_mosaic.version = 11 : i64} {
  func.func @_staged_proj_kernel(%arg0: i32, %arg1: memref<16x256xbf16, #tpu.memory_space<vmem>>, %arg2: memref<256x32xbf16, #tpu.memory_space<vmem>>, %arg3: memref<1x32xf32, #tpu.memory_space<vmem>>, %arg4: memref<16x32xf32, #tpu.memory_space<vmem>>) attributes {dimension_semantics = [#tpu.dimension_semantics<parallel>], iteration_bounds = array<i64: 1>, scalar_prefetch = 0 : i64, scratch_operands = 0 : i64, tpu.core_type = #tpu.core_type<tc>, window_params = [{transform_indices = @transform_0, window_bounds = array<i64: 16, 256>}, {pipeline_mode = #tpu.pipeline_mode<synchronous>, transform_indices = @transform_1, window_bounds = array<i64: 256, 32>}, {pipeline_mode = #tpu.pipeline_mode<synchronous>, transform_indices = @transform_2, window_bounds = array<i64: 1, 32>}, {transform_indices = @transform_3, window_bounds = array<i64: 16, 32>}]} {
    %c0 = arith.constant 0 : index
    %c0_0 = arith.constant 0 : index
    %0 = vector.load %arg1[%c0, %c0_0] : memref<16x256xbf16, #tpu.memory_space<vmem>>, vector<16x256xbf16>
    %c0_1 = arith.constant 0 : index
    %c0_2 = arith.constant 0 : index
    %1 = vector.load %arg2[%c0_1, %c0_2] : memref<256x32xbf16, #tpu.memory_space<vmem>>, vector<256x32xbf16>
    %cst = arith.constant dense<0.000000e+00> : vector<16x32xf32>
    %2 = tpu.matmul %0, %1, %cst {dimension_numbers = #tpu.dot_dimension_numbers<[1], [0], [0], [1], [0, 0, 1, 1], [], []>} : vector<16x256xbf16>, vector<256x32xbf16>, vector<16x32xf32> -> vector<16x32xf32>
    %c0_3 = arith.constant 0 : index
    %c0_4 = arith.constant 0 : index
    %3 = vector.load %arg3[%c0_3, %c0_4] : memref<1x32xf32, #tpu.memory_space<vmem>>, vector<1x32xf32>
    %4 = vector.broadcast %3 : vector<1x32xf32> to vector<16x32xf32>
    %5 = arith.addf %2, %4 : vector<16x32xf32>
    %c0_5 = arith.constant 0 : index
    %c0_6 = arith.constant 0 : index
    %6 = vector.load %arg4[%c0_5, %c0_6] : memref<16x32xf32, #tpu.memory_space<vmem>>, vector<16x32xf32>
    tpu.vector_store %arg4[%c0_5, %c0_6], %5 {strides = array<i32>} : memref<16x32xf32, #tpu.memory_space<vmem>>, vector<16x32xf32>,
    return
  }
  func.func @transform_0(%arg0: i32) -> (i32, i32) {
    %c0_i32 = arith.constant 0 : i32
    %c0_i32_0 = arith.constant 0 : i32
    return %arg0, %c0_i32 : i32, i32
  }
  func.func @transform_1(%arg0: i32) -> (i32, i32) {
    %c0_i32 = arith.constant 0 : i32
    %c0_i32_0 = arith.constant 0 : i32
    %c0_i32_1 = arith.constant 0 : i32
    return %c0_i32, %c0_i32_0 : i32, i32
  }
  func.func @transform_2(%arg0: i32) -> (i32, i32) {
    %c0_i32 = arith.constant 0 : i32
    %c0_i32_0 = arith.constant 0 : i32
    %c0_i32_1 = arith.constant 0 : i32
    return %c0_i32, %c0_i32_0 : i32, i32
  }
  func.func @transform_3(%arg0: i32) -> (i32, i32) {
    %c0_i32 = arith.constant 0 : i32
    %c0_i32_0 = arith.constant 0 : i32
    return %arg0, %c0_i32 : i32, i32
  }
}

</mosaic_0001>

<bundles_post_ra>
// kernel: _patch_embed_impl.1
= control target key start
LH: loop header
LB: loop body
LE: loop exit
PB: predicated region body
PF: predicated region fallthrough
CT: control target
= control target key end

     0   :  { %s402_s0 = inlined_call_operand.vmem [shape: bf16[16,256], index: 0, kind: input, shape index: {}]   ;;  %s403_s1 = inlined_call_operand.vmem [shape: bf16[256,32], index: 1, kind: input, shape index: {}]   ;;  %s404_s2 = inlined_call_operand.vmem [shape: f32[1,32], index: 2, kind: input, shape index: {}]   ;;  %s405_s3 = inlined_call_operand.hbm [shape: f32[16,32], index: 3, kind: output, shape index: {}]  }
   0x1   :  { %v267_v0 = vld [vmem:[%s403_s1 + $0x40] sm:$0xff]   ;;  %v269_v2 = vld [vmem:[%s403_s1 + $0x48] sm:$0xff]   ;;  %v271_v4 = vld [vmem:[%s403_s1 + $0x50] sm:$0xff]  }
   0x2   :  { %v268_v1 = vld [vmem:[%s403_s1] sm:$0xff]   ;;  %242 = vmatprep.subr.bf16.mxu0 %v267_v0  ;;  %v270_v3 = vld [vmem:[%s403_s1 + $0x8] sm:$0xff]   ;;  %v272_v5 = vld [vmem:[%s403_s1 + $0x10] sm:$0xff]  }
   0x3   :  { %243 = vmatpush3.bf16.msra.mxu0 %v268_v1  ;;  %v273_v6 = vld [vmem:[%s403_s1 + $0x58] sm:$0xff]   ;;  %v275_v8 = vld [vmem:[%s403_s1 + $0x60] sm:$0xff]   ;;  %v277_v10 = vld [vmem:[%s403_s1 + $0x68] sm:$0xff]  }
   0x4   :  { %244 = vmatprep.subr.bf16.mxu0 %v269_v2  ;;  %v274_v7 = vld [vmem:[%s403_s1 + $0x18] sm:$0xff]   ;;  %v276_v9 = vld [vmem:[%s403_s1 + $0x20] sm:$0xff]  }
   0x5   :  { %v285_v11 = vld [vmem:[%s402_s0 + $0x4] ss:$8 sps:$4 sm:$0xff]  }
   0x7   :  { %245 = vmatpush3.bf16.msra.mxu0 %v270_v3 }
   0x8   :  { %246 = vmatprep.subr.bf16.mxu0 %v271_v4 }
   0xb   :  { %247 = vmatpush3.bf16.msra.mxu0 %v272_v5 }
   0xc   :  { %248 = vmatprep.subr.bf16.mxu0 %v273_v6 }
   0xf   :  { %249 = vmatpush3.bf16.msra.mxu0 %v274_v7 }
  0x10   :  { %250 = vmatprep.subr.bf16.mxu0 %v275_v8 }
  0x11   :  { %8 = vsyncpa [#allocation3], 0  ;;  %v278_v12 = vld [vmem:[%s403_s1 + $0x28] sm:$0xff]   ;;  %195 = vmatprep.mubr.bf16.mxu0 %v285_v11  ;;  %v279_v13 = vld [vmem:[%s403_s1 + $0x70] sm:$0xff]   ;;  %s310_s23 = smov [#allocation2]   ;;  %vm204_vm0 = vcmask 261120  }
  0x12   :  { %v280_v14 = vld [vmem:[%s403_s1 + $0x30] sm:$0xff]   ;;  %v281_v15 = vld [vmem:[%s403_s1 + $0x78] sm:$0xff]   ;;  %v283_v17 = vld [vmem:[%s402_s0] ss:$8 sps:$4 sm:$0xff]   ;;  %s212_s24 = sshll.u32 %s310_s23, 4  ;;  %s213_s24 = int_to_ptr.vmem [resolvable:$true] %s212_s24 }
  0x13   :  { %251 = vmatpush3.bf16.msra.mxu0 %v276_v9  ;;  %v282_v16 = vld [vmem:[%s403_s1 + $0x38] sm:$0xff]   ;;  %v223_v19 = vld [vmem:[%s404_s2] ss:$0 sm:$0xff]  ;;  %s286_s0 = scalar_lea.vmem %s213_s24, 256  ;;  %p291_p1 = scmp.lt.s32.totalorder %s213_s24, %s213_s24 }
  0x14   :  { %252 = vmatprep.subr.bf16.mxu0 %v277_v10  ;;  %p287_p0 = scmp.ne.s32.totalorder %s213_s24, %s286_s0  ;;  %p292_p2 = scmp.lt.s32.totalorder %s286_s0, %s286_s0 }
  0x16   :  { %p293_p3 = por %p292_p2, %p291_p1 }
  0x17   :  { %253 = vmatpush3.bf16.msra.mxu0 %v278_v12 }
  0x18   :  { %254 = vmatprep.subr.bf16.mxu0 %v279_v13  ;;  %p294_p4 = pnand %p293_p3, %p287_p0 }
  0x1b   :  { %255 = vmatpush3.bf16.msra.mxu0 %v280_v14 }
  0x1c   :  { %256 = vmatprep.subr.bf16.mxu0 %v281_v15 }
  0x1f   :  { %257 = vmatpush3.bf16.msra.mxu0 %v282_v16 }
  0x22   :  { %196 = vmatmul.mubr.bf16.vlgmr.msra.gmra.mrb[0].mxu0 %v283_v17 }
  0xf5   :  { %v258_v18 = vpop.f32.mrb[0].mxu0 }
  0xf6   :  { %v259_v20 = vpop.f32.mrb[1].mxu0 }
  0xf7   :  { %v260_v21 = vadd.f32 %v259_v20, %v258_v18  ;;  %v261_v22 = vpop.f32.mrb[2].mxu0 }
  0xf8   :  { %v262_v23 = vpop.f32.mrb[3].mxu0 }
  0xf9   :  { %v198_v24 = vadd.f32 %v260_v21, %v223_v19  ;;  %v263_v25 = vadd.f32 %v262_v23, %v261_v22 }
  0xfb   :  { %205 = vst.msk [vmem:[#allocation2] sm:$0xff] %vm204_vm0, %v198_v24  ;;  %v201_v26 = vadd.f32 %v263_v25, %v223_v19 }
  0xfd   :  { %206 = vst.msk [vmem:[#allocation2 + $0x8] sm:$0xff] %vm204_vm0, %v201_v26 }
  0xfe   :  { %297 = shalt.err (!%p294_p4)
}
  0xff   :  { %s298_s25 = scalar_lea.hbm %s405_s3, 256 }
 0x100   :  { %p299_p5 = scmp.ne.s32.totalorder %s405_s3, %s298_s25  ;;  %p302_p6 = scmp.lt.u32.totalorder %s298_s25, %s405_s3 }
 0x102   :  { %p304_p7 = pnand %p302_p6, %p299_p5 }
 0x104   :  { %307 = shalt.err (!%p304_p7)
}
 0x105   :  { %s311_s30 = smov 128   ;;  %s312_s4 = smov 8  }
 0x106   :  { %218 = dma.vmem_to_hbm [thread:$0]  %s213_s24, 256, %s405_s3, [#allocation3], %s311_s30, %s311_s30, %s312_s4  }
 0x107   :  { %308 = dma.done.wait [#allocation3], 256  }
 0x108   :  { %309 = vsyncadd [#allocation3], 4294967040 }
 0x109   :  { %222 = vsyncpa [#allocation3], 1 }

</bundles_post_ra>
